<compile_context>
chip_gen: v6e
topology: v6e:2x2x1
jax: 0.10.0
libtpu: 0.0.40
codegen_flags: <defaults>
</compile_context>

<pallas_src>
import functools

import jax
import jax.numpy as jnp
from jax import lax
from jax.experimental import pallas as pl
from jax.experimental.pallas import tpu as pltpu


# ---------------------------------------------------------------------------
# Pallas kernel: one grid step == one batch element, full HxWxC tile in VMEM.
# ---------------------------------------------------------------------------
def prm_kernel(x_ref,                      # (1, H+2, WE*C) padded, lane-folded input
               w3b_ref, s1_ref, b1_ref,    # 3x3 conv as banded (WE*C, W*C) matmuls + BN
               w21_ref, s21_ref, b21_ref,  # pool 1x1: (W*C, C) vertically tiled
               w22_ref, s22_ref, b22_ref,  # gate 1x1: (C, W*C) horizontally tiled
               w31_ref, s31_ref, b31_ref,  # branch-3 1x1: block-diag (W*C, W*C)
               wdw_ref, s32_ref, b32_ref,  # depthwise 9x9 (9, 9, W*C) + BN (1, W*C)
               o_ref,                      # (1, H, W*C) lane-dense output slab
               pad_ref,                    # scratch (H+16, (W+8)*C) f32
               *, H, W, C, roll_fwd):
    WL = W * C                  # folded lane width of interior / output
    LT = (W + 8) * C            # folded lane width of the padded dw scratch

    xb = x_ref[0].astype(jnp.bfloat16)                       # (H+2, WE*C)

    # ---- prm_1: 3x3 conv (pad 1) + BN + ReLU, directly in folded layout ----
    # Three banded full-lane-width matmuls; out1 is born as (H, W*C).
    out1 = jnp.zeros((H, WL), jnp.float32)
    for dy in range(3):
        out1 = out1 + jnp.dot(xb[dy:dy + H, :], w3b_ref[dy],
                              preferred_element_type=jnp.float32)
    out1 = jnp.maximum(out1 * s1_ref[...] + b1_ref[...], 0.0)    # (H, W*C)
    out1_b = out1.astype(jnp.bfloat16)

    # ---- branch 2: global avg pool -> 1x1 -> 1x1 -> sigmoid ----
    # The W part of the pool reduction rides the MXU K axis (w21 tiled
    # vertically); the W broadcast of the gate rides the MXU N axis (w22 tiled
    # horizontally), so out_2 comes out as a (1, W*C) row with no lane concat.
    # Issued before the depthwise loop so the M=1 MXU drains are hidden.
    pooled = (jnp.sum(out1, axis=0, keepdims=True)
              * (1.0 / (H * W))).astype(jnp.bfloat16)             # (1, W*C)
    v = jnp.maximum(jnp.dot(pooled, w21_ref[...],
                            preferred_element_type=jnp.float32)
                    * s21_ref[...] + b21_ref[...], 0.0)           # (1, C)
    z = jnp.dot(v.astype(jnp.bfloat16), w22_ref[...],
                preferred_element_type=jnp.float32)               # (1, W*C)
    out2 = jax.nn.sigmoid(jnp.maximum(z * s22_ref[...] + b22_ref[...], 0.0))

    # ---- branch 3: 1x1 conv + BN + ReLU via block-diagonal folded weight ----
    t = jnp.maximum(jnp.dot(out1_b, w31_ref[...],
                            preferred_element_type=jnp.float32)
                    * s31_ref[...] + b31_ref[...], 0.0)           # (H, W*C)

    # ---- stage t into the padded, lane-folded scratch ----
    # Interior at rows [8, 8+H), lanes [4*C, (4+W)*C): sublane/lane aligned
    # for C=32.  Only the halo ring is zeroed; the interior is fully
    # overwritten each step, so the "parallel" batch axis stays correct.
    pad_ref[0:8, :] = jnp.zeros((8, LT), jnp.float32)
    pad_ref[8 + H:16 + H, :] = jnp.zeros((8, LT), jnp.float32)
    pad_ref[8:8 + H, 0:4 * C] = jnp.zeros((H, 4 * C), jnp.float32)
    pad_ref[8:8 + H, (4 + W) * C:LT] = jnp.zeros((H, 4 * C), jnp.float32)
    pad_ref[8:8 + H, 4 * C:(4 + W) * C] = t

    # ---- depthwise 9x9 (pad 4), lane-folded, on the VPU ----
    # dx taps grouped by lane-alignment class (exact for any C; 128-aligned
    # when C % 32 == 0): one lane-rotate per misaligned class replaces the
    # misaligned extracts.  dy loop partially unrolled (unroll=3) to bound
    # vreg pressure while still giving the LLO scheduler room to interleave.
    def dy_body(dy, acc):
        rows = pad_ref[pl.ds(4 + dy, H), :]                       # (H, (W+8)*C)
        wrow = wdw_ref[dy]                                        # (9, W*C)
        for dx in (0, 4, 8):                                      # aligned class
            acc = acc + rows[:, dx * C:dx * C + WL] * wrow[dx:dx + 1, :]
        for r in (1, 2, 3):                                       # one roll/class
            shift = (LT - r * C) if roll_fwd else (r * C)         # rot[:,j]=rows[:,j+r*C]
            rot = pltpu.roll(rows, shift=shift, axis=1)
            for dx in (r, r + 4):
                base = (dx - r) * C                               # 0 or 4*C: aligned
                acc = acc + rot[:, base:base + WL] * wrow[dx:dx + 1, :]
        return acc

    dw = lax.fori_loop(0, 9, dy_body, jnp.zeros((H, WL), jnp.float32), unroll=3)
    out3 = jax.nn.sigmoid(jnp.maximum(dw * s32_ref[...] + b32_ref[...], 0.0))

    # ---- combine: out = out_1 * (1 + out_2 * out_3), lane-dense store ----
    o_ref[0] = out1 * (1.0 + out2 * out3)


# ---------------------------------------------------------------------------
# One-time probe: pin pltpu.roll's rotate direction (defensive, cached).
# ---------------------------------------------------------------------------
@functools.lru_cache(maxsize=None)
def _roll_matches_jnp_roll():
    def k(x_ref, o_ref):
        o_ref[...] = pltpu.roll(x_ref[...], shift=1, axis=1)

    x = lax.broadcasted_iota(jnp.float32, (8, 128), 1)
    out = pl.pallas_call(
        k, out_shape=jax.ShapeDtypeStruct((8, 128), jnp.float32))(x)
    # jnp.roll convention: element 0 moves to index 1.
    return bool(jax.device_get(out[0, 1]) == 0.0)


# ---------------------------------------------------------------------------
# Wrapper: NCHW in, NCHW out; all heavy compute runs inside the Pallas kernel.
# ---------------------------------------------------------------------------
def prm_forward(x_nchw, params):
    N, C, H, W = x_nchw.shape
    x = jnp.transpose(x_nchw, (0, 2, 3, 1)).astype(jnp.float32)      # NHWC

    # 1-px halo for the 3x3 plus extra zero columns on the right so the folded
    # input row width WE*C is a multiple of 128 lanes (unmasked loads).
    r_extra = 0
    while ((W + 2 + r_extra) * C) % 128 != 0 and r_extra < 8:
        r_extra += 1
    WE = W + 2 + r_extra
    x_pad = jnp.pad(x, ((0, 0), (1, 1), (1, 1 + r_extra), (0, 0)))
    x_f = x_pad.reshape(N, H + 2, WE * C)          # free row-major lane-fold

    (w3, s1, b1, w21, s21, b21, w22, s22, b22,
     w31, s31, b31, wdw, s32, b32) = params

    # ---- pre-fold weights (cheap, one-time XLA ops), MXU weights in bf16 ----
    # Banded 3x3 weight: Wband[dy][(w+dx)*C+ci, w*C+co] = w3[dy, dx, ci, co].
    def shift_sel(dx):
        return jnp.zeros((WE, W), jnp.float32).at[
            jnp.arange(W) + dx, jnp.arange(W)].set(1.0)

    w3b = jnp.stack(
        [sum(jnp.kron(shift_sel(dx), w3[dy, dx]) for dx in range(3))
         for dy in range(3)]).astype(jnp.bfloat16)                 # (3, WE*C, W*C)

    w31blk = jnp.kron(jnp.eye(W, dtype=jnp.float32),
                      w31).astype(jnp.bfloat16)                    # (W*C, W*C)
    w21f = jnp.tile(w21, (W, 1)).astype(jnp.bfloat16)              # (W*C, C)
    w22f = jnp.tile(w22, (1, W)).astype(jnp.bfloat16)              # (C, W*C)

    tile_w = lambda a: jnp.tile(a, (1, W))                         # (1,C)->(1,W*C)
    s1f, b1f = tile_w(s1), tile_w(b1)
    s22f, b22f = tile_w(s22), tile_w(b22)
    s31f, b31f = tile_w(s31), tile_w(b31)
    s32f, b32f = tile_w(s32), tile_w(b32)
    wdwf = jnp.tile(wdw, (1, 1, W))                                # (9, 9, W*C) f32

    full = lambda shape: pl.BlockSpec(shape, lambda n: (0,) * len(shape))

    out = pl.pallas_call(
        functools.partial(prm_kernel, H=H, W=W, C=C,
                          roll_fwd=_roll_matches_jnp_roll()),
        out_shape=jax.ShapeDtypeStruct((N, H, W * C), jnp.float32),
        grid_spec=pltpu.PrefetchScalarGridSpec(
            num_scalar_prefetch=0,
            grid=(N,),
            in_specs=[
                pl.BlockSpec((1, H + 2, WE * C), lambda n: (n, 0, 0)),
                full((3, WE * C, W * C)), full((1, W * C)), full((1, W * C)),
                full((W * C, C)), full((1, C)), full((1, C)),
                full((C, W * C)), full((1, W * C)), full((1, W * C)),
                full((W * C, W * C)), full((1, W * C)), full((1, W * C)),
                full((9, 9, W * C)), full((1, W * C)), full((1, W * C)),
            ],
            out_specs=pl.BlockSpec((1, H, W * C), lambda n: (n, 0, 0)),
            scratch_shapes=[pltpu.VMEM((H + 16, (W + 8) * C), jnp.float32)],
        ),
        compiler_params=pltpu.CompilerParams(
            dimension_semantics=("parallel",),        # v7x: 2 TCs share batch
            vmem_limit_bytes=32 * 1024 * 1024),
    )(x_f, w3b, s1f, b1f, w21f, s21, b21, w22f, s22f, b22f,
      w31blk, s31f, b31f, wdwf, s32f, b32f)

    out = out.reshape(N, H, W, C)                  # free: same row-major layout
    return jnp.transpose(out, (0, 3, 1, 2))        # NCHW


# ---------------------------------------------------------------------------
# Deterministic parameter init (conv weight/bias + BN folded to scale/bias).
# ---------------------------------------------------------------------------
def make_params(key, C):
    def bn_fold(k, conv_bias):
        kg, kb, km, kv = jax.random.split(k, 4)
        gamma = 1.0 + 0.1 * jax.random.normal(kg, (C,), jnp.float32)
        beta = 0.1 * jax.random.normal(kb, (C,), jnp.float32)
        mean = 0.1 * jax.random.normal(km, (C,), jnp.float32)
        var = 0.5 + jax.random.uniform(kv, (C,), jnp.float32)
        scale = gamma / jnp.sqrt(var + 1e-5)
        bias = beta + scale * (conv_bias - mean)
        return scale.reshape(1, C), bias.reshape(1, C)

    keys = jax.random.split(key, 20)
    # conv3x3 (HWIO), conv biases, 1x1 convs as (Cin, Cout), depthwise (9,9,C)
    w3 = 0.1 * jax.random.normal(keys[0], (3, 3, C, C), jnp.float32)
    b3 = 0.05 * jax.random.normal(keys[1], (C,), jnp.float32)
    w21 = 0.1 * jax.random.normal(keys[2], (C, C), jnp.float32)
    b21c = 0.05 * jax.random.normal(keys[3], (C,), jnp.float32)
    w22 = 0.1 * jax.random.normal(keys[4], (C, C), jnp.float32)
    b22c = 0.05 * jax.random.normal(keys[5], (C,), jnp.float32)
    w31 = 0.1 * jax.random.normal(keys[6], (C, C), jnp.float32)
    b31c = 0.05 * jax.random.normal(keys[7], (C,), jnp.float32)
    wdw = 0.1 * jax.random.normal(keys[8], (9, 9, C), jnp.float32)
    b32c = 0.05 * jax.random.normal(keys[9], (C,), jnp.float32)

    s1, b1 = bn_fold(keys[10], b3)
    s21, b21 = bn_fold(keys[11], b21c)
    s22, b22 = bn_fold(keys[12], b22c)
    s31, b31 = bn_fold(keys[13], b31c)
    s32, b32 = bn_fold(keys[14], b32c)

    return (w3, s1, b1, w21, s21, b21, w22, s22, b22,
            w31, s31, b31, wdw, s32, b32)


# ---------------------------------------------------------------------------
# Pure-JAX reference (NHWC) for correctness checking.
# ---------------------------------------------------------------------------
def prm_reference(x_nchw, params):
    (w3, s1, b1, w21, s21, b21, w22, s22, b22,
     w31, s31, b31, wdw, s32, b32) = params
    x = jnp.transpose(x_nchw, (0, 2, 3, 1)).astype(jnp.float32)
    C = x.shape[-1]

    def cbr(y, w_hwio, scale, bias, groups=1):
        out = lax.conv_general_dilated(
            y, w_hwio, (1, 1), "SAME",
            dimension_numbers=("NHWC", "HWIO", "NHWC"),
            feature_group_count=groups)
        return jnp.maximum(out * scale.reshape(1, 1, 1, C)
                           + bias.reshape(1, 1, 1, C), 0.0)

    out1 = cbr(x, w3, s1, b1)
    pooled = jnp.mean(out1, axis=(1, 2), keepdims=True)
    v = jnp.maximum(jnp.einsum("nhwc,cd->nhwd", pooled, w21)
                    * s21.reshape(1, 1, 1, C) + b21.reshape(1, 1, 1, C), 0.0)
    v = jnp.maximum(jnp.einsum("nhwc,cd->nhwd", v, w22)
                    * s22.reshape(1, 1, 1, C) + b22.reshape(1, 1, 1, C), 0.0)
    out2 = jax.nn.sigmoid(v)
    t = jnp.maximum(jnp.einsum("nhwc,cd->nhwd", out1, w31)
                    * s31.reshape(1, 1, 1, C) + b31.reshape(1, 1, 1, C), 0.0)
    out3 = jax.nn.sigmoid(cbr(t, wdw[:, :, None, :], s32, b32, groups=C))
    out = out1 * (1.0 + out2 * out3)
    return jnp.transpose(out, (0, 3, 1, 2))


if __name__ == "__main__":
    N, C, H, W = 2, 32, 16, 16
    key = jax.random.PRNGKey(0)
    kx, kp = jax.random.split(key)
    x = jax.random.normal(kx, (N, C, H, W), jnp.float32)
    params = make_params(kp, C)

    out = jax.block_until_ready(prm_forward(x, params))
    ref = jax.block_until_ready(prm_reference(x, params))

    assert out.shape == (N, C, H, W)
    # bf16 MXU operands (f32 accumulation) vs. the pure-f32 reference: use a
    # bf16-level tolerance; any structural bug (wrong tap / offset / rotate)
    # would exceed it by orders of magnitude.
    max_err = float(jnp.max(jnp.abs(out - ref)))
    assert jnp.allclose(out, ref, rtol=5e-2, atol=5e-2), max_err

    print("KERNEL_OK")
</pallas_src>

<mosaic_0001>
module attributes {stable_mosaic.version = 11 : i64} {
  func.func @k(%arg0: memref<8x128xf32, #tpu.memory_space<vmem>>, %arg1: memref<8x128xf32, #tpu.memory_space<vmem>>) attributes {dimension_semantics = [], scalar_prefetch = 0 : i64, scratch_operands = 0 : i64, tpu.core_type = #tpu.core_type<tc>} {
    %c0 = arith.constant 0 : index
    %c0_0 = arith.constant 0 : index
    %0 = vector.load %arg0[%c0, %c0_0] : memref<8x128xf32, #tpu.memory_space<vmem>>, vector<8x128xf32>
    %c1_i32 = arith.constant 1 : i32
    %1 = tpu.dynamic_rotate %0 by %c1_i32 dim 1 : vector<8x128xf32>, i32 -> vector<8x128xf32>
    %c0_1 = arith.constant 0 : index
    %c0_2 = arith.constant 0 : index
    %2 = vector.load %arg1[%c0_1, %c0_2] : memref<8x128xf32, #tpu.memory_space<vmem>>, vector<8x128xf32>
    tpu.vector_store %arg1[%c0_1, %c0_2], %1 {strides = array<i32>} : memref<8x128xf32, #tpu.memory_space<vmem>>, vector<8x128xf32>,
    return
  }
}

</mosaic_0001>

<bundles_post_ra>
// kernel: tpu_custom_call.1
= control target key start
LH: loop header
LB: loop body
LE: loop exit
PB: predicated region body
PF: predicated region fallthrough
CT: control target
= control target key end

     0   :  { %6 = vsyncpa [#allocation3], 0  ;;  %s106_s0 = inlined_call_operand.hbm [shape: f32[8,128], index: 0, kind: input, shape index: {}]   ;;  %s107_s1 = inlined_call_operand.hbm [shape: f32[8,128], index: 1, kind: output, shape index: {}]  }
   0x1   :  { %7 = vsyncpa [#allocation4], 0  ;;  %s87_s6 = smov [#allocation2]  }
   0x2   :  { %s14_s7 = sshll.u32 %s87_s6, 4  ;;  %s15_s7 = int_to_ptr.vmem [resolvable:$true] %s14_s7 }
   0x3   :  { %s51_s8 = scalar_lea.vmem %s15_s7, 128  ;;  %p56_p1 = scmp.lt.s32.totalorder %s15_s7, %s15_s7 }
   0x4   :  { %p52_p0 = scmp.ne.s32.totalorder %s15_s7, %s51_s8  ;;  %p57_p2 = scmp.lt.s32.totalorder %s51_s8, %s51_s8 }
   0x6   :  { %p58_p3 = por %p57_p2, %p56_p1 }
   0x8   :  { %p59_p4 = pnand %p58_p3, %p52_p0 }
   0xa   :  { %62 = shalt.err (!%p59_p4)
}
   0xb   :  { %17 = dma.hbm_to_vmem [thread:$0]  %s106_s0, 128, %s15_s7, [#allocation3]  }
   0xc   :  { %83 = dma.done.wait [#allocation3], 128  }
   0xd   :  { %84 = vsyncadd [#allocation3], 4294967168  ;;  %v21_v0 = vld [vmem:[#allocation2] sm:$0xff]  ;;  %s88_s11 = smov 1   ;;  %s89_s12 = smov [#allocation5]  }
   0xe   :  { %22 = vrot.lane.b32.xlu0 %v21_v0, %s88_s11  ;;  %s31_s13 = sshll.u32 %s89_s12, 4  ;;  %s32_s13 = int_to_ptr.vmem [resolvable:$true] %s31_s13 }
   0xf   :  { %s63_s14 = scalar_lea.vmem %s32_s13, 128  ;;  %p68_p6 = scmp.lt.s32.totalorder %s32_s13, %s32_s13 }
  0x10   :  { %p64_p5 = scmp.ne.s32.totalorder %s32_s13, %s63_s14  ;;  %p69_p7 = scmp.lt.s32.totalorder %s63_s14, %s63_s14 }
  0x12   :  { %p70_p8 = por %p69_p7, %p68_p6 }
  0x14   :  { %p71_p9 = pnand %p70_p8, %p64_p5 }
  0x80   :  { %v23_v1 = vpop.permute.xlu0 %22 }
  0x81   :  { %24 = vst [vmem:[#allocation5] sm:$0xff] %v23_v1 }
  0x82   :  { %74 = shalt.err (!%p71_p9)
}
  0x83   :  { %34 = dma.vmem_to_hbm [thread:$0]  %s32_s13, 128, %s107_s1, [#allocation4]  }
  0x84   :  { %85 = dma.done.wait [#allocation4], 128  }
  0x85   :  { %86 = vsyncadd [#allocation4], 4294967168 }
  0x86   :  { %38 = vsyncpa [#allocation3], 1 }
  0x87   :  { %39 = vsyncpa [#allocation4], 1 }

</bundles_post_ra>
